<compile_context>
chip_gen: v6e
topology: v6e:2x2x1
jax: 0.10.0
libtpu: 0.0.40
codegen_flags: <defaults>
</compile_context>

<pallas_src>
import functools
import math

import jax
import jax.numpy as jnp
from jax import lax
from jax.experimental import pallas as pl
from jax.experimental.pallas import tpu as pltpu

_LANE = 128
_SUB = 8
# Finite (bf16-safe) loss-neutral tail-pad logit: with t = 0 it gives
# bce ≈ 1.8e-35 and (1-pt)^2 ≈ 3e-70, so the product underflows to exactly 0.
_PAD_X = -80.0


def _round_up(v, m):
    return -(-v // m) * m


def _sublane_align(dtype):
    # Sublane multiple required by packed layouts: f32->8, bf16->16, int8->32.
    return {4: 8, 2: 16, 1: 32}.get(jnp.dtype(dtype).itemsize, 8)


def _default_num_splits():
    # The 2-way "parallel" leading axis only pays off on multi-TensorCore
    # chips (v7x); on single-TC v5e/v6e it just halves tiles_per_split.
    try:
        kind = jax.devices()[0].device_kind.lower()
        if "v7" in kind or "7x" in kind:
            return 2
    except Exception:
        pass
    return 1


def _focal_loss_kernel(x_ref, t_ref, out_ref, *, gamma, valid_rows,
                       tiles_per_split, needs_mask, use_approx_recip):
    i = pl.program_id(1)  # reduction ("arbitrary") axis

    @pl.when(i == 0)
    def _():
        out_ref[...] = jnp.zeros_like(out_ref)

    # Inputs stay in their HBM dtype; cast to f32 after the load (VPU cast is
    # hidden under the DMA in this bandwidth-bound kernel).
    x = x_ref[...].astype(jnp.float32)
    t = t_ref[...].astype(jnp.float32)

    # Numerically-stable BCE-with-logits; e = exp(-|x|) computed once (1 EUP exp)
    # and reused for both the log1p term and the sigmoid.
    e = jnp.exp(-jnp.abs(x))
    bce = jnp.maximum(x, 0.0) - x * t + jnp.log1p(e)

    # 1/(1+e): exact divide by default (keeps bit-parity with the reference);
    # approx reciprocal lands on the otherwise-idle EUP slot and helps on v7x.
    one_pe = 1.0 + e
    inv = pl.reciprocal(one_pe, approx=True) if use_approx_recip else 1.0 / one_pe

    # q = 1 - pt with pt = where(t==1, sigmoid(x), 1-sigmoid(x)), fused:
    # the numerator is e exactly when (t==1) == (x>=0), i.e. (t==1) xor (x<0).
    q = jnp.where(jnp.logical_xor(t == 1.0, x < 0.0), e, 1.0) * inv

    # (1 - pt) ** gamma : integer gamma via repeated multiply (no exp/log pow).
    g = float(gamma)
    if g.is_integer() and 0.0 <= g <= 16.0:
        n = int(g)
        w = jnp.ones_like(q) if n == 0 else q
        for _ in range(max(n - 1, 0)):
            w = w * q
    else:
        w = q ** g  # TODO(synk): non-integer gamma falls back to exp/log pow on EUP.

    focal = w * bce  # (tr, 128) f32

    r, l = focal.shape
    if needs_mask:
        # Emitted only when the tile grid doesn't exactly cover the row range:
        # zero out garbage rows coming from the partial boundary block.
        row_start = (pl.program_id(0) * tiles_per_split + i) * r
        grow = row_start + lax.broadcasted_iota(jnp.int32, (r, l), 0)
        focal = jnp.where(grow < valid_rows, focal, 0.0)

    # Fold the row-tile axis with pure VPU adds into the vreg-shaped (8,128)
    # output block (VMEM-resident across the i axis since its index_map ignores
    # i); the expensive cross-lane reduce to a scalar happens once, outside.
    out_ref[0, ...] += focal.reshape(r // _SUB, _SUB, l).sum(axis=0)


def focal_loss(inputs, targets, *, gamma=2.0, reduction="mean",
               tile_rows=2048, num_splits=None, use_approx_recip=False):
    """Pallas TPU focal loss; arbitrary (matching) input/target shapes & dtypes."""
    assert inputs.shape == targets.shape
    total = math.prod(inputs.shape) if inputs.shape else 1

    x = inputs.reshape(-1)
    t = targets.reshape(-1)
    if t.dtype == jnp.bool_:
        t = t.astype(jnp.int8)  # same byte width, layout-friendly loads

    if num_splits is None:
        num_splits = _default_num_splits()
    num_splits = max(int(num_splits), 1)

    # Lane-dense layout: rows of 128 lanes. Only a tiny (<128-element)
    # loss-neutral tail pad is ever materialized; everything else is masked
    # inside the kernel (no full-array concatenate, no HBM dtype up-cast).
    rows = pl.cdiv(total, _LANE)
    pad = rows * _LANE - total
    if pad:
        x = jnp.concatenate([x, jnp.full((pad,), _PAD_X, x.dtype)])
        t = jnp.concatenate([t, jnp.zeros((pad,), t.dtype)])
    x2 = x.reshape(rows, _LANE)
    t2 = t.reshape(rows, _LANE)

    align = max(_sublane_align(x2.dtype), _sublane_align(t2.dtype))
    tr = min(int(tile_rows), _round_up(pl.cdiv(rows, num_splits), align))
    tr = max(align, _round_up(tr, align))
    tiles_per_split = pl.cdiv(rows, num_splits * tr)
    if num_splits > 1 and (num_splits - 1) * tiles_per_split * tr >= rows:
        # A later split would be entirely out of bounds (tiny input) —
        # keep a single split (also what v5e/v6e want anyway).
        num_splits = 1
        tiles_per_split = pl.cdiv(rows, tr)
    needs_mask = (num_splits * tiles_per_split * tr != rows)

    kernel = functools.partial(
        _focal_loss_kernel, gamma=float(gamma), valid_rows=rows,
        tiles_per_split=tiles_per_split, needs_mask=needs_mask,
        use_approx_recip=use_approx_recip)

    tps = tiles_per_split
    partials = pl.pallas_call(
        kernel,
        out_shape=jax.ShapeDtypeStruct((num_splits, _SUB, _LANE), jnp.float32),
        grid_spec=pltpu.PrefetchScalarGridSpec(
            num_scalar_prefetch=0,
            grid=(num_splits, tiles_per_split),
            in_specs=[
                pl.BlockSpec((tr, _LANE), lambda p, i: (p * tps + i, 0)),
                pl.BlockSpec((tr, _LANE), lambda p, i: (p * tps + i, 0)),
            ],
            out_specs=pl.BlockSpec((1, _SUB, _LANE), lambda p, i: (p, 0, 0)),
        ),
        compiler_params=pltpu.CompilerParams(
            # Row range shards across TensorCores on v7x; the reduction axis
            # stays sequential per core. Harmless on single-TC chips.
            dimension_semantics=("parallel", "arbitrary"),
        ),
    )(x2, t2)

    total_sum = jnp.sum(partials)
    if reduction == "mean":
        return total_sum / jnp.float32(total)
    return total_sum


def _reference_focal_loss(x, t, gamma=2.0, reduction="mean"):
    x = x.astype(jnp.float32)
    t = t.astype(jnp.float32)
    bce = jnp.maximum(x, 0.0) - x * t + jnp.log1p(jnp.exp(-jnp.abs(x)))
    p = jax.nn.sigmoid(x)
    pt = jnp.where(t == 1.0, p, 1.0 - p)
    fl = (1.0 - pt) ** gamma * bce
    return jnp.mean(fl) if reduction == "mean" else jnp.sum(fl)


if __name__ == "__main__":
    key = jax.random.PRNGKey(0)
    k1, k2 = jax.random.split(key)

    # Module-style small shape: batch=2, channels=4, 16x16 spatial logit map.
    shape = (2, 4, 16, 16)
    inputs = jax.random.normal(k1, shape, dtype=jnp.float32) * 2.0
    targets = (jax.random.uniform(k2, shape) > 0.5).astype(jnp.float32)

    # 1) mean reduction, 128-aligned size (no pad, no in-kernel mask).
    loss = jax.block_until_ready(
        focal_loss(inputs, targets, gamma=2.0, reduction="mean"))
    ref = _reference_focal_loss(inputs, targets, gamma=2.0, reduction="mean")
    assert jnp.allclose(loss, ref, rtol=1e-5, atol=1e-6), (loss, ref)

    # 2) sum reduction, row-partial size (exercises in-kernel boundary mask).
    xi, ti = inputs[:, :, :, :13], targets[:, :, :, :13]
    loss_s = jax.block_until_ready(focal_loss(xi, ti, gamma=2.0, reduction="sum"))
    ref_s = _reference_focal_loss(xi, ti, gamma=2.0, reduction="sum")
    assert jnp.allclose(loss_s, ref_s, rtol=1e-5, atol=1e-5), (loss_s, ref_s)

    # 3) non-128-aligned total + bf16 logits in HBM (tiny tail pad + mask + cast).
    xj = inputs[:, :3, :, :11].astype(jnp.bfloat16)
    tj = targets[:, :3, :, :11]
    loss_b = jax.block_until_ready(focal_loss(xj, tj, gamma=2.0, reduction="mean"))
    ref_b = _reference_focal_loss(xj.astype(jnp.float32), tj, gamma=2.0,
                                  reduction="mean")
    assert jnp.allclose(loss_b, ref_b, rtol=1e-4, atol=1e-5), (loss_b, ref_b)

    print("KERNEL_OK")
</pallas_src>

<mosaic_0001>
module attributes {stable_mosaic.version = 11 : i64} {
  func.func @_focal_loss_kernel(%arg0: i32, %arg1: i32, %arg2: memref<16x128xf32, #tpu.memory_space<vmem>>, %arg3: memref<16x128xf32, #tpu.memory_space<vmem>>, %arg4: memref<1x8x128xf32, #tpu.memory_space<vmem>>) attributes {dimension_semantics = [#tpu.dimension_semantics<parallel>, #tpu.dimension_semantics<arbitrary>], iteration_bounds = array<i64: 1, 1>, scalar_prefetch = 0 : i64, scratch_operands = 0 : i64, tpu.core_type = #tpu.core_type<tc>, window_params = [{transform_indices = @transform_0, window_bounds = array<i64: 16, 128>}, {transform_indices = @transform_1, window_bounds = array<i64: 16, 128>}, {transform_indices = @transform_2, window_bounds = array<i64: 1, 8, 128>}]} {
    %c0_i32 = arith.constant 0 : i32
    %0 = arith.cmpi eq, %arg1, %c0_i32 : i32
    %1 = arith.extui %0 : i1 to i32
    %c0_i32_0 = arith.constant 0 : i32
    %2 = arith.cmpi ne, %1, %c0_i32_0 : i32
    scf.if %2 {
      %cst_17 = arith.constant 0.000000e+00 : f32
      %37 = vector.broadcast %cst_17 : f32 to vector<1x8x128xf32>
      %c0_18 = arith.constant 0 : index
      %c0_19 = arith.constant 0 : index
      %c0_20 = arith.constant 0 : index
      %38 = vector.load %arg4[%c0_18, %c0_19, %c0_20] : memref<1x8x128xf32, #tpu.memory_space<vmem>>, vector<1x8x128xf32>
      tpu.vector_store %arg4[%c0_18, %c0_19, %c0_20], %37 {strides = array<i32>} : memref<1x8x128xf32, #tpu.memory_space<vmem>>, vector<1x8x128xf32>,
    } else {
    }
    %c0 = arith.constant 0 : index
    %c0_1 = arith.constant 0 : index
    %3 = vector.load %arg2[%c0, %c0_1] : memref<16x128xf32, #tpu.memory_space<vmem>>, vector<16x128xf32>
    %c0_2 = arith.constant 0 : index
    %c0_3 = arith.constant 0 : index
    %4 = vector.load %arg3[%c0_2, %c0_3] : memref<16x128xf32, #tpu.memory_space<vmem>>, vector<16x128xf32>
    %5 = math.absf %3 : vector<16x128xf32>
    %cst = arith.constant 0.000000e+00 : f32
    %6 = vector.broadcast %cst : f32 to vector<16x128xf32>
    %7 = arith.subf %6, %5 : vector<16x128xf32>
    %8 = math.exp %7 : vector<16x128xf32>
    %cst_4 = arith.constant 0.000000e+00 : f32
    %9 = vector.broadcast %cst_4 : f32 to vector<16x128xf32>
    %10 = arith.maximumf %3, %9 : vector<16x128xf32>
    %11 = arith.mulf %3, %4 : vector<16x128xf32>
    %12 = arith.subf %10, %11 : vector<16x128xf32>
    %13 = math.log1p %8 : vector<16x128xf32>
    %14 = arith.addf %12, %13 : vector<16x128xf32>
    %cst_5 = arith.constant 1.000000e+00 : f32
    %15 = vector.broadcast %cst_5 : f32 to vector<16x128xf32>
    %16 = arith.addf %15, %8 : vector<16x128xf32>
    %cst_6 = arith.constant 1.000000e+00 : f32
    %17 = vector.broadcast %cst_6 : f32 to vector<16x128xf32>
    %18 = arith.divf %17, %16 : vector<16x128xf32>
    %cst_7 = arith.constant 1.000000e+00 : f32
    %19 = vector.broadcast %cst_7 : f32 to vector<16x128xf32>
    %20 = arith.cmpf oeq, %4, %19 : vector<16x128xf32>
    %cst_8 = arith.constant 0.000000e+00 : f32
    %21 = vector.broadcast %cst_8 : f32 to vector<16x128xf32>
    %22 = arith.cmpf olt, %3, %21 : vector<16x128xf32>
    %23 = arith.xori %20, %22 : vector<16x128xi1>
    %cst_9 = arith.constant 1.000000e+00 : f32
    %24 = vector.broadcast %cst_9 : f32 to vector<16x128xf32>
    %25 = arith.select %23, %8, %24 : vector<16x128xi1>, vector<16x128xf32>
    %26 = arith.mulf %25, %18 : vector<16x128xf32>
    %27 = arith.mulf %26, %26 : vector<16x128xf32>
    %28 = arith.mulf %27, %14 : vector<16x128xf32>
    %c0_10 = arith.constant 0 : index
    %c0_11 = arith.constant 0 : index
    %c0_12 = arith.constant 0 : index
    %29 = vector.load %arg4[%c0_10, %c0_11, %c0_12] : memref<1x8x128xf32, #tpu.memory_space<vmem>>, vector<1x8x128xf32>
    %30 = vector.shape_cast %29 : vector<1x8x128xf32> to vector<8x128xf32>
    %31 = vector.shape_cast %28 : vector<16x128xf32> to vector<2x8x128xf32>
    %cst_13 = arith.constant dense<0.000000e+00> : vector<8x128xf32>
    %32 = vector.multi_reduction <add>, %31, %cst_13 [0] : vector<2x8x128xf32> to vector<8x128xf32>
    %33 = arith.addf %30, %32 : vector<8x128xf32>
    %c0_14 = arith.constant 0 : index
    %c0_15 = arith.constant 0 : index
    %c0_16 = arith.constant 0 : index
    %34 = vector.load %arg4[%c0_14, %c0_15, %c0_16] : memref<1x8x128xf32, #tpu.memory_space<vmem>>, vector<1x8x128xf32>
    %35 = vector.shape_cast %34 : vector<1x8x128xf32> to vector<8x128xf32>
    %36 = vector.shape_cast %33 : vector<8x128xf32> to vector<1x8x128xf32>
    tpu.vector_store %arg4[%c0_14, %c0_15, %c0_16], %36 {strides = array<i32>} : memref<1x8x128xf32, #tpu.memory_space<vmem>>, vector<1x8x128xf32>,
    return
  }
  func.func @transform_0(%arg0: i32, %arg1: i32) -> (i32, i32) {
    %c1_i32 = arith.constant 1 : i32
    %0 = arith.muli %arg0, %c1_i32 : i32
    %1 = arith.addi %0, %arg1 : i32
    %c0_i32 = arith.constant 0 : i32
    %c0_i32_0 = arith.constant 0 : i32
    return %1, %c0_i32 : i32, i32
  }
  func.func @transform_1(%arg0: i32, %arg1: i32) -> (i32, i32) {
    %c1_i32 = arith.constant 1 : i32
    %0 = arith.muli %arg0, %c1_i32 : i32
    %1 = arith.addi %0, %arg1 : i32
    %c0_i32 = arith.constant 0 : i32
    %c0_i32_0 = arith.constant 0 : i32
    return %1, %c0_i32 : i32, i32
  }
  func.func @transform_2(%arg0: i32, %arg1: i32) -> (i32, i32, i32) {
    %c0_i32 = arith.constant 0 : i32
    %c0_i32_0 = arith.constant 0 : i32
    %c0_i32_1 = arith.constant 0 : i32
    return %arg0, %c0_i32, %c0_i32_0 : i32, i32, i32
  }
}

</mosaic_0001>

<bundles_post_ra>
// kernel: tpu_custom_call.1
= control target key start
LH: loop header
LB: loop body
LE: loop exit
PB: predicated region body
PF: predicated region fallthrough
CT: control target
= control target key end

     0   :  { %7 = vsyncpa [#allocation3], 0  ;;  %s260_s0 = inlined_call_operand.hbm [shape: f32[16,128], index: 0, kind: input, shape index: {}]   ;;  %s261_s1 = inlined_call_operand.hbm [shape: f32[16,128], index: 1, kind: input, shape index: {}]   ;;  %s262_s2 = inlined_call_operand.hbm [shape: f32[1,8,128], index: 2, kind: output, shape index: {}]  }
   0x1   :  { %8 = vsyncpa [#allocation6], 0 }
   0x2   :  { %9 = vsyncpa [#allocation4], 0  ;;  %s219_s9 = smov [#allocation2]  }
   0x3   :  { %s19_s10 = sshll.u32 %s219_s9, 4  ;;  %s20_s10 = int_to_ptr.vmem [resolvable:$true] %s19_s10 }
   0x4   :  { %s161_s11 = scalar_lea.vmem %s20_s10, 256  ;;  %p166_p1 = scmp.lt.s32.totalorder %s20_s10, %s20_s10 }
   0x5   :  { %p162_p0 = scmp.ne.s32.totalorder %s20_s10, %s161_s11  ;;  %p167_p2 = scmp.lt.s32.totalorder %s161_s11, %s161_s11 }
   0x7   :  { %p168_p3 = por %p167_p2, %p166_p1 }
   0x9   :  { %p169_p4 = pnand %p168_p3, %p162_p0 }
   0xb   :  { %172 = shalt.err (!%p169_p4)
}
   0xc   :  { %s220_s12 = smov 128   ;;  %s221_s13 = smov 8  }
   0xd   :  { %25 = dma.hbm_to_vmem [thread:$0]  %s260_s0, 256, %s20_s10, [#allocation3], %s220_s12, %s220_s12, %s221_s13  }
   0xe   :  { %s222_s16 = smov [#allocation5]  }
   0xf   :  { %s35_s17 = sshll.u32 %s222_s16, 4  ;;  %s36_s17 = int_to_ptr.vmem [resolvable:$true] %s35_s17 }
  0x10   :  { %s181_s18 = scalar_lea.vmem %s36_s17, 256  ;;  %p186_p6 = scmp.lt.s32.totalorder %s36_s17, %s36_s17 }
  0x11   :  { %p182_p5 = scmp.ne.s32.totalorder %s36_s17, %s181_s18  ;;  %p187_p7 = scmp.lt.s32.totalorder %s181_s18, %s181_s18 }
  0x13   :  { %p188_p8 = por %p187_p7, %p186_p6 }
  0x15   :  { %p189_p9 = pnand %p188_p8, %p182_p5 }
  0x17   :  { %192 = shalt.err (!%p189_p9)
}
  0x18   :  { %41 = dma.hbm_to_vmem [thread:$0]  %s261_s1, 256, %s36_s17, [#allocation6], %s220_s12, %s220_s12, %s221_s13  }
  0x19   :  { %213 = dma.done.wait [#allocation3], 256  }
  0x1a   :  { %214 = vsyncadd [#allocation3], 4294967040 }
  0x1b   :  { %215 = dma.done.wait [#allocation6], 256  }
  0x1c   :  { %216 = vsyncadd [#allocation6], 4294967040  ;;  %v57_v0 = vld [vmem:[#allocation2] sm:$0xff]  ;;  %v58_v1 = vld [vmem:[#allocation2 + $0x8] sm:$0xff]  ;;  %s223_s0 = smov [#allocation7]  }
  0x1d   :  { %v61_v2 = vand.u32 2147483647, %v57_v0  ;;  %v62_v3 = vand.u32 2147483647, %v58_v1  ;;  %v59_v12 = vld [vmem:[#allocation5] sm:$0xff]  ;;  %v60_v14 = vld [vmem:[#allocation5 + $0x8] sm:$0xff] }
  0x1e   :  { %vm101_vm0 = vcmp.eq.f32.partialorder %v59_v12, 1.0  ;;  %vm103_vm1 = vcmp.lt.f32.partialorder %v57_v0, 0.0  ;;  %vm102_vm2 = vcmp.eq.f32.partialorder %v60_v14, 1.0  ;;  %vm104_vm3 = vcmp.lt.f32.partialorder %v58_v1, 0.0  ;;  %s125_s1 = sshll.u32 %s223_s0, 4  ;;  %s126_s1 = int_to_ptr.vmem [resolvable:$true] %s125_s1 }
  0x1f   :  { %v63_v4 = vsub.f32 0.0, %v61_v2  ;;  %v64_v5 = vsub.f32 0.0, %v62_v3  ;;  %v69_v17 = vmax.f32 %v57_v0, 0.0  ;;  %v71_v18 = vmul.f32 %v59_v12, %v57_v0  ;;  %vm245_vm4 = vmxor %vm101_vm0, %vm103_vm1  ;;  %s193_s21 = scalar_lea.vmem %s126_s1, 128  ;;  %p198_p11 = scmp.lt.s32.totalorder %s126_s1, %s126_s1 }
  0x20   :  { %v70_v21 = vmax.f32 %v58_v1, 0.0  ;;  %v72_v22 = vmul.f32 %v60_v14, %v58_v1  ;;  %vm249_vm5 = vmxor %vm102_vm2, %vm104_vm3  ;;  %p194_p10 = scmp.ne.s32.totalorder %s126_s1, %s193_s21  ;;  %p199_p12 = scmp.lt.s32.totalorder %s193_s21, %s193_s21 }
  0x21   :  { %v65_v6 = vmul.f32 1.442695, %v63_v4  ;;  %v67_v7 = vmul.f32 1.442695, %v64_v5  ;;  %v73_v28 = vsub.f32 %v69_v17, %v71_v18 }
  0x22   :  { %v74_v32 = vsub.f32 %v70_v21, %v72_v22  ;;  %p200_p13 = por %p199_p12, %p198_p11 }
  0x23   :  { %141 = vpow2.f32 %v65_v6 }
  0x24   :  { %143 = vpow2.f32 %v67_v7  ;;  %p201_p0 = pnand %p200_p13, %p194_p10 }
  0x30   :  { %v142_v8 = vpop.eup %141 }
  0x31   :  { %v144_v9 = vpop.eup %143  ;;  %v75_v10 = vadd.f32 1.0, %v142_v8  ;;  %v78_v13 = vmul.f32 -0.5, %v142_v8  ;;  %v81_v19 = vand.u32 2147483647, %v142_v8  ;;  %v107_v30 = vsel %vm245_vm4, %v142_v8, 1.0 }
  0x32   :  { %v84_v11 = vadd.f32 1.0, %v144_v9  ;;  %v87_v15 = vmul.f32 -0.5, %v144_v9  ;;  %v90_v23 = vand.u32 2147483647, %v144_v9  ;;  %v108_v34 = vsel %vm249_vm5, %v144_v9, 1.0 }
  0x33   :  { %145 = vlog2.f32 %v75_v10  ;;  %v79_v16 = vadd.f32 1.0, %v78_v13  ;;  %vm82_vm6 = vcmp.lt.f32.partialorder %v81_v19, 0.0004427343 }
  0x34   :  { %147 = vlog2.f32 %v84_v11  ;;  %v88_v20 = vadd.f32 1.0, %v87_v15  ;;  %vm91_vm7 = vcmp.lt.f32.partialorder %v90_v23, 0.0004427343 }
  0x35   :  { %149 = vrcp.f32 %v75_v10  ;;  %v80_v26 = vmul.f32 %v142_v8, %v79_v16 }
  0x36   :  { %151 = vrcp.f32 %v84_v11  ;;  %v89_v29 = vmul.f32 %v144_v9, %v88_v20 }
  0x40   :  { %v146_v27 = vpop.eup %145 }
  0x41   :  { %v148_v31 = vpop.eup %147  ;;  %v77_v33 = vmul.f32 0.6931472, %v146_v27 }
  0x42   :  { %v150_v35 = vpop.eup %149  ;;  %v86_v36 = vmul.f32 0.6931472, %v148_v31 }
  0x43   :  { %v152_v37 = vpop.eup %151  ;;  %v83_v38 = vsel %vm82_vm6, %v80_v26, %v77_v33  ;;  %v109_v39 = vmul.f32 %v150_v35, %v107_v30 }
  0x44   :  { %v92_v40 = vsel %vm91_vm7, %v89_v29, %v86_v36  ;;  %v93_v41 = vadd.f32 %v83_v38, %v73_v28  ;;  %v110_v42 = vmul.f32 %v152_v37, %v108_v34 }
  0x45   :  { %v94_v43 = vadd.f32 %v92_v40, %v74_v32  ;;  %v111_v44 = vmul.f32 %v109_v39, %v109_v39 }
  0x46   :  { %v112_v45 = vmul.f32 %v110_v42, %v110_v42 }
  0x47   :  { %v113_v46 = vmul.f32 %v111_v44, %v93_v41 }
  0x48   :  { %v114_v47 = vmul.f32 %v112_v45, %v94_v43 }
  0x4a   :  { %v116_v48 = vadd.f32 %v114_v47, %v113_v46 }
  0x4c   :  { %118 = vst [vmem:[#allocation7] sm:$0xff] %v116_v48 }
  0x4d   :  { %204 = shalt.err (!%p201_p0)
}
  0x4e   :  { %128 = dma.vmem_to_hbm [thread:$0]  %s126_s1, 128, %s262_s2, [#allocation4]  }
  0x4f   :  { %217 = dma.done.wait [#allocation4], 128  }
  0x50   :  { %218 = vsyncadd [#allocation4], 4294967168 }
  0x51   :  { %132 = vsyncpa [#allocation3], 1 }
  0x52   :  { %133 = vsyncpa [#allocation6], 1 }
  0x53   :  { %134 = vsyncpa [#allocation4], 1 }

</bundles_post_ra>
